<compile_context>
chip_gen: v5e
topology: v5e:2x2
jax: 0.10.0
libtpu: 0.0.40
codegen_flags: <defaults>
</compile_context>

<pallas_src>
import functools

import jax
import jax.numpy as jnp
from jax.experimental import pallas as pl
from jax.experimental.pallas import tpu as pltpu

LANE = 128  # TPU lane width


# ----------------------------- Fused Pallas kernel ---------------------------
def _ffn_fused_kernel(*refs, n_layers, act, mxu_dtype):
    """One row-tile of the whole MLP: all matmuls + biases + activations fused.

    refs layout: (x_ref, w_0..w_{L-1}, b_0..b_{L-1}, o_ref)
    """
    x_ref = refs[0]
    w_refs = refs[1:1 + n_layers]
    b_refs = refs[1 + n_layers:1 + 2 * n_layers]
    o_ref = refs[1 + 2 * n_layers]

    h = x_ref[...].astype(jnp.float32)
    for i in range(n_layers):
        # bf16 operands on the MXU, f32 accumulation.
        lhs = h.astype(mxu_dtype)
        rhs = w_refs[i][...].astype(mxu_dtype)
        h = jnp.dot(lhs, rhs, preferred_element_type=jnp.float32)
        h = h + b_refs[i][...].astype(jnp.float32)   # (1, N) broadcasts
        if i < n_layers - 1 and act is not None:
            h = act(h)                               # hidden layers only (f32)
    o_ref[...] = h.astype(o_ref.dtype)


def _choose_tm(m, max_tm):
    """Row tile: single step for tiny batches, otherwise >=2 steps (v7x) with
    tiles as large as possible (up to max_tm) to amortize per-step overhead."""
    max_tm = max(8, (max_tm // 8) * 8)
    if m <= 256:
        return m                       # launch-overhead bound anyway
    half = (m + 1) // 2
    half = ((half + 7) // 8) * 8       # keep tm a multiple of 8
    return min(max_tm, half)


def feedforward_pallas(x, weights, biases, activation=jax.nn.silu, *,
                       max_tm=4096, use_bf16_mxu=True):
    """Fused MLP (FeedForward.forward) in one pallas_call.

    x:       (M, K0) float32
    weights: list of (K_i, N_i) float32  (transposed PyTorch weights)
    biases:  list of (N_i,) float32
    """
    M, K0 = x.shape
    n_layers = len(weights)
    assert weights[0].shape[0] == K0
    N_out = weights[-1].shape[1]

    mxu_dtype = jnp.bfloat16 if use_bf16_mxu else jnp.float32

    # Weights in MXU dtype (halves their DMA when bf16); biases as (1, N) f32.
    w_list = [w.astype(mxu_dtype) for w in weights]
    b_list = [b.reshape(1, -1).astype(jnp.float32) for b in biases]

    # Lane-dense output: zero-pad the last layer's width up to a multiple of
    # 128 so the final store is an unmasked, full-lane vst.  Sliced back below.
    N_pad = ((N_out + LANE - 1) // LANE) * LANE
    if N_pad != N_out:
        w_list[-1] = jnp.pad(w_list[-1], ((0, 0), (0, N_pad - N_out)))
        b_list[-1] = jnp.pad(b_list[-1], ((0, 0), (0, N_pad - N_out)))

    tm = _choose_tm(M, max_tm)
    grid = (pl.cdiv(M, tm),)

    # x / out tiles are row-indexed; weights & biases are full-block with a
    # constant index_map, so they are DMA'd once and stay resident in VMEM.
    in_specs = [pl.BlockSpec((tm, K0), lambda i: (i, 0))]
    for w in w_list:
        kw, nw = w.shape
        in_specs.append(pl.BlockSpec((kw, nw), lambda i: (0, 0)))
    for b in b_list:
        in_specs.append(pl.BlockSpec(b.shape, lambda i: (0, 0)))
    out_spec = pl.BlockSpec((tm, N_pad), lambda i: (i, 0))

    # >=2 steps -> shard rows across TensorCores (v7x); single step -> nothing
    # to shard, keep it "arbitrary".
    dim_sem = ("parallel",) if grid[0] > 1 else ("arbitrary",)

    # Advisory cost estimate so XLA schedules neighboring ops sensibly.
    flops = 2 * M * sum(int(w.shape[0]) * int(w.shape[1]) for w in weights)
    transcendentals = M * sum(int(w.shape[1]) for w in weights[:-1])  # SiLU exp
    bytes_accessed = (x.size * x.dtype.itemsize
                      + M * N_pad * x.dtype.itemsize
                      + sum(w.size * w.dtype.itemsize for w in w_list)
                      + sum(b.size * b.dtype.itemsize for b in b_list))
    cost = pl.CostEstimate(flops=flops, transcendentals=transcendentals,
                           bytes_accessed=bytes_accessed)

    # Explicit scoped-VMEM ceiling: double-buffered I/O tiles + resident
    # weights/biases + generous headroom for the f32 intermediates.  Capped at
    # 64 MiB so the same number is valid on v7x (64 MiB physical VMEM).
    widths = [K0] + [int(w.shape[1]) for w in w_list]
    vmem_est = (2 * tm * (K0 + N_pad) * 4
                + 2 * sum(w.size * w.dtype.itemsize for w in w_list)
                + 2 * sum(b.size * 4 for b in b_list)
                + 4 * tm * max(widths) * 4)
    vmem_limit = int(min(max(2 * vmem_est, 32 * 1024 * 1024),
                         64 * 1024 * 1024))

    kernel = functools.partial(_ffn_fused_kernel, n_layers=n_layers,
                               act=activation, mxu_dtype=mxu_dtype)

    out_padded = pl.pallas_call(
        kernel,
        out_shape=jax.ShapeDtypeStruct((M, N_pad), x.dtype),
        grid_spec=pltpu.PrefetchScalarGridSpec(
            num_scalar_prefetch=0,
            grid=grid,
            in_specs=in_specs,
            out_specs=out_spec,
        ),
        compiler_params=pltpu.CompilerParams(
            dimension_semantics=dim_sem,
            vmem_limit_bytes=vmem_limit),
        cost_estimate=cost,
    )(x, *w_list, *b_list)

    if N_pad != N_out:
        return out_padded[:, :N_out]
    return out_padded


# --------------------------- Parameter init ----------------------------------
def xavier_uniform(key, in_features, out_features, dtype=jnp.float32):
    """Matches torch.nn.init.xavier_uniform_ on a (out, in) weight (gain=1)."""
    limit = jnp.sqrt(6.0 / (in_features + out_features))
    # Stored directly in (in, out) layout == W.T
    return jax.random.uniform(key, (in_features, out_features),
                              minval=-limit, maxval=limit, dtype=dtype)


def init_feedforward(key, n_nodes, last_zero_init=False):
    weights, biases = [], []
    n_layers = len(n_nodes) - 1
    keys = jax.random.split(key, n_layers)
    for i in range(n_layers):
        fin, fout = n_nodes[i], n_nodes[i + 1]
        if last_zero_init and i == n_layers - 1:
            w_t = jnp.zeros((fin, fout), jnp.float32)
        else:
            w_t = xavier_uniform(keys[i], fin, fout)
        b = jnp.zeros((fout,), jnp.float32)  # bias_init = zeros_
        weights.append(w_t)
        biases.append(b)
    return weights, biases


# ------------------------------ Reference ------------------------------------
def feedforward_ref(x, weights, biases, activation=jax.nn.silu,
                    mxu_dtype=jnp.float32):
    """Pure-JAX reference; mxu_dtype mirrors the kernel's matmul operand cast."""
    h = x.astype(jnp.float32)
    n_layers = len(weights)
    for i, (w_t, b) in enumerate(zip(weights, biases)):
        h = jnp.dot(h.astype(mxu_dtype), w_t.astype(mxu_dtype),
                    preferred_element_type=jnp.float32) + b
        if i < n_layers - 1:
            h = activation(h)
    return h


# ---------------------------------- main --------------------------------------
if __name__ == "__main__":
    key = jax.random.PRNGKey(0)
    k_param, k_x = jax.random.split(key)

    n_nodes = (32, 64, 64, 16)   # FeedForward(32, 64, 64, 16, activation=SiLU)
    weights, biases = init_feedforward(k_param, n_nodes)

    fwd_bf16 = jax.jit(functools.partial(
        feedforward_pallas, activation=jax.nn.silu, use_bf16_mxu=True))
    fwd_f32 = jax.jit(functools.partial(
        feedforward_pallas, activation=jax.nn.silu, use_bf16_mxu=False))

    test_cases = [
        # (name, batch, use_bf16, tolerance)
        ("tiny-batch-bf16", 16, True, 2e-3),    # shipped instantiation size
        ("multi-step-bf16", 512, True, 2e-3),   # 2 grid steps / parallel axis
        ("tiny-batch-f32", 16, False, 1e-4),    # exact-path sanity check
    ]
    for name, batch, use_bf16, tol in test_cases:
        x = jax.random.normal(jax.random.fold_in(k_x, batch),
                              (batch, n_nodes[0]), dtype=jnp.float32)
        fwd = fwd_bf16 if use_bf16 else fwd_f32
        out = jax.block_until_ready(fwd(x, weights, biases))
        ref = feedforward_ref(
            x, weights, biases,
            mxu_dtype=jnp.bfloat16 if use_bf16 else jnp.float32)
        assert out.shape == (batch, n_nodes[-1]), name
        assert jnp.allclose(out, ref, atol=tol, rtol=tol), name

    print("KERNEL_OK")
</pallas_src>

<mosaic_0001>
module attributes {stable_mosaic.version = 11 : i64} {
  func.func @_ffn_fused_kernel(%arg0: i32, %arg1: memref<16x32xf32, #tpu.memory_space<vmem>>, %arg2: memref<32x64xbf16, #tpu.memory_space<vmem>>, %arg3: memref<64x64xbf16, #tpu.memory_space<vmem>>, %arg4: memref<64x128xbf16, #tpu.memory_space<vmem>>, %arg5: memref<1x64xf32, #tpu.memory_space<vmem>>, %arg6: memref<1x64xf32, #tpu.memory_space<vmem>>, %arg7: memref<1x128xf32, #tpu.memory_space<vmem>>, %arg8: memref<16x128xf32, #tpu.memory_space<vmem>>) attributes {dimension_semantics = [#tpu.dimension_semantics<arbitrary>], iteration_bounds = array<i64: 1>, scalar_prefetch = 0 : i64, scratch_operands = 0 : i64, tpu.core_type = #tpu.core_type<tc>, window_params = [{transform_indices = @transform_0, window_bounds = array<i64: 16, 32>}, {pipeline_mode = #tpu.pipeline_mode<synchronous>, transform_indices = @transform_1, window_bounds = array<i64: 32, 64>}, {pipeline_mode = #tpu.pipeline_mode<synchronous>, transform_indices = @transform_2, window_bounds = array<i64: 64, 64>}, {pipeline_mode = #tpu.pipeline_mode<synchronous>, transform_indices = @transform_3, window_bounds = array<i64: 64, 128>}, {pipeline_mode = #tpu.pipeline_mode<synchronous>, transform_indices = @transform_4, window_bounds = array<i64: 1, 64>}, {pipeline_mode = #tpu.pipeline_mode<synchronous>, transform_indices = @transform_5, window_bounds = array<i64: 1, 64>}, {pipeline_mode = #tpu.pipeline_mode<synchronous>, transform_indices = @transform_6, window_bounds = array<i64: 1, 128>}, {transform_indices = @transform_7, window_bounds = array<i64: 16, 128>}]} {
    %c0 = arith.constant 0 : index
    %c0_0 = arith.constant 0 : index
    %0 = vector.load %arg1[%c0, %c0_0] : memref<16x32xf32, #tpu.memory_space<vmem>>, vector<16x32xf32>
    %1 = arith.truncf %0 : vector<16x32xf32> to vector<16x32xbf16>
    %c0_1 = arith.constant 0 : index
    %c0_2 = arith.constant 0 : index
    %2 = vector.load %arg2[%c0_1, %c0_2] : memref<32x64xbf16, #tpu.memory_space<vmem>>, vector<32x64xbf16>
    %cst = arith.constant dense<0.000000e+00> : vector<16x64xf32>
    %3 = tpu.matmul %1, %2, %cst {dimension_numbers = #tpu.dot_dimension_numbers<[1], [0], [0], [1], [0, 0, 1, 1], [], []>} : vector<16x32xbf16>, vector<32x64xbf16>, vector<16x64xf32> -> vector<16x64xf32>
    %c0_3 = arith.constant 0 : index
    %c0_4 = arith.constant 0 : index
    %4 = vector.load %arg5[%c0_3, %c0_4] : memref<1x64xf32, #tpu.memory_space<vmem>>, vector<1x64xf32>
    %5 = vector.broadcast %4 : vector<1x64xf32> to vector<16x64xf32>
    %6 = arith.addf %3, %5 : vector<16x64xf32>
    %7 = arith.negf %6 : vector<16x64xf32>
    %8 = math.exp %7 : vector<16x64xf32>
    %cst_5 = arith.constant 1.000000e+00 : f32
    %9 = vector.broadcast %cst_5 : f32 to vector<16x64xf32>
    %10 = arith.addf %9, %8 : vector<16x64xf32>
    %11 = arith.divf %9, %10 : vector<16x64xf32>
    %12 = arith.mulf %6, %11 : vector<16x64xf32>
    %13 = arith.truncf %12 : vector<16x64xf32> to vector<16x64xbf16>
    %c0_6 = arith.constant 0 : index
    %c0_7 = arith.constant 0 : index
    %14 = vector.load %arg3[%c0_6, %c0_7] : memref<64x64xbf16, #tpu.memory_space<vmem>>, vector<64x64xbf16>
    %cst_8 = arith.constant dense<0.000000e+00> : vector<16x64xf32>
    %15 = tpu.matmul %13, %14, %cst_8 {dimension_numbers = #tpu.dot_dimension_numbers<[1], [0], [0], [1], [0, 0, 1, 1], [], []>} : vector<16x64xbf16>, vector<64x64xbf16>, vector<16x64xf32> -> vector<16x64xf32>
    %c0_9 = arith.constant 0 : index
    %c0_10 = arith.constant 0 : index
    %16 = vector.load %arg6[%c0_9, %c0_10] : memref<1x64xf32, #tpu.memory_space<vmem>>, vector<1x64xf32>
    %17 = vector.broadcast %16 : vector<1x64xf32> to vector<16x64xf32>
    %18 = arith.addf %15, %17 : vector<16x64xf32>
    %19 = arith.negf %18 : vector<16x64xf32>
    %20 = math.exp %19 : vector<16x64xf32>
    %cst_11 = arith.constant 1.000000e+00 : f32
    %21 = vector.broadcast %cst_11 : f32 to vector<16x64xf32>
    %22 = arith.addf %21, %20 : vector<16x64xf32>
    %23 = arith.divf %21, %22 : vector<16x64xf32>
    %24 = arith.mulf %18, %23 : vector<16x64xf32>
    %25 = arith.truncf %24 : vector<16x64xf32> to vector<16x64xbf16>
    %c0_12 = arith.constant 0 : index
    %c0_13 = arith.constant 0 : index
    %26 = vector.load %arg4[%c0_12, %c0_13] : memref<64x128xbf16, #tpu.memory_space<vmem>>, vector<64x128xbf16>
    %cst_14 = arith.constant dense<0.000000e+00> : vector<16x128xf32>
    %27 = tpu.matmul %25, %26, %cst_14 {dimension_numbers = #tpu.dot_dimension_numbers<[1], [0], [0], [1], [0, 0, 1, 1], [], []>} : vector<16x64xbf16>, vector<64x128xbf16>, vector<16x128xf32> -> vector<16x128xf32>
    %c0_15 = arith.constant 0 : index
    %c0_16 = arith.constant 0 : index
    %28 = vector.load %arg7[%c0_15, %c0_16] : memref<1x128xf32, #tpu.memory_space<vmem>>, vector<1x128xf32>
    %29 = vector.broadcast %28 : vector<1x128xf32> to vector<16x128xf32>
    %30 = arith.addf %27, %29 : vector<16x128xf32>
    %c0_17 = arith.constant 0 : index
    %c0_18 = arith.constant 0 : index
    %31 = vector.load %arg8[%c0_17, %c0_18] : memref<16x128xf32, #tpu.memory_space<vmem>>, vector<16x128xf32>
    tpu.vector_store %arg8[%c0_17, %c0_18], %30 {strides = array<i32>} : memref<16x128xf32, #tpu.memory_space<vmem>>, vector<16x128xf32>,
    return
  }
  func.func @transform_0(%arg0: i32) -> (i32, i32) {
    %c0_i32 = arith.constant 0 : i32
    %c0_i32_0 = arith.constant 0 : i32
    return %arg0, %c0_i32 : i32, i32
  }
  func.func @transform_1(%arg0: i32) -> (i32, i32) {
    %c0_i32 = arith.constant 0 : i32
    %c0_i32_0 = arith.constant 0 : i32
    %c0_i32_1 = arith.constant 0 : i32
    return %c0_i32, %c0_i32_0 : i32, i32
  }
  func.func @transform_2(%arg0: i32) -> (i32, i32) {
    %c0_i32 = arith.constant 0 : i32
    %c0_i32_0 = arith.constant 0 : i32
    %c0_i32_1 = arith.constant 0 : i32
    return %c0_i32, %c0_i32_0 : i32, i32
  }
  func.func @transform_3(%arg0: i32) -> (i32, i32) {
    %c0_i32 = arith.constant 0 : i32
    %c0_i32_0 = arith.constant 0 : i32
    %c0_i32_1 = arith.constant 0 : i32
    return %c0_i32, %c0_i32_0 : i32, i32
  }
  func.func @transform_4(%arg0: i32) -> (i32, i32) {
    %c0_i32 = arith.constant 0 : i32
    %c0_i32_0 = arith.constant 0 : i32
    %c0_i32_1 = arith.constant 0 : i32
    return %c0_i32, %c0_i32_0 : i32, i32
  }
  func.func @transform_5(%arg0: i32) -> (i32, i32) {
    %c0_i32 = arith.constant 0 : i32
    %c0_i32_0 = arith.constant 0 : i32
    %c0_i32_1 = arith.constant 0 : i32
    return %c0_i32, %c0_i32_0 : i32, i32
  }
  func.func @transform_6(%arg0: i32) -> (i32, i32) {
    %c0_i32 = arith.constant 0 : i32
    %c0_i32_0 = arith.constant 0 : i32
    %c0_i32_1 = arith.constant 0 : i32
    return %c0_i32, %c0_i32_0 : i32, i32
  }
  func.func @transform_7(%arg0: i32) -> (i32, i32) {
    %c0_i32 = arith.constant 0 : i32
    %c0_i32_0 = arith.constant 0 : i32
    return %arg0, %c0_i32 : i32, i32
  }
}

</mosaic_0001>

<bundles_post_ra>
// kernel: feedforward_pallas.1
= control target key start
LH: loop header
LB: loop body
LE: loop exit
PB: predicated region body
PF: predicated region fallthrough
CT: control target
= control target key end

     0   :  { %s476_s0 = inlined_call_operand.vmem [shape: f32[16,32], index: 0, kind: input, shape index: {}]   ;;  %s477_s1 = inlined_call_operand.vmem [shape: bf16[32,64], index: 1, kind: input, shape index: {}]   ;;  %s478_s2 = inlined_call_operand.vmem [shape: bf16[64,64], index: 2, kind: input, shape index: {}]   ;;  %s479_s3 = inlined_call_operand.vmem [shape: bf16[64,128], index: 3, kind: input, shape index: {}]   ;;  %s480_s4 = inlined_call_operand.vmem [shape: f32[1,64], index: 4, kind: input, shape index: {}]   ;;  %s481_s5 = inlined_call_operand.vmem [shape: f32[1,64], index: 5, kind: input, shape index: {}]   ;;  %s482_s6 = inlined_call_operand.vmem [shape: f32[1,128], index: 6, kind: input, shape index: {}]   ;;  %s483_s7 = inlined_call_operand.hbm [shape: f32[16,128], index: 7, kind: output, shape index: {}]  }
   0x1   :  { %v326_v0 = vld [vmem:[%s477_s1 + $0x8] sm:$0xff]  ;;  %v325_v1 = vld [vmem:[%s477_s1] sm:$0xff] }
   0x2   :  { %v28_v2 = vld [vmem:[%s476_s0] sm:$0xff]  ;;  %v29_v3 = vld [vmem:[%s476_s0 + $0x8] sm:$0xff]  ;;  %61 = vmatpush.bf16.msra.mxu0 %v326_v0 }
   0x3   :  { %12 = vsyncpa [#allocation3], 0  ;;  %v30_v4 = vpack.c.bf16 %v29_v3, %v28_v2  ;;  %vm51_vm0 = vcmask 261120   ;;  %v330_v5 = vld [vmem:[%s478_s2 + $0x18] sm:$0xff]  ;;  %v338_v6 = vld [vmem:[%s480_s4] ss:$0 sm:$0xff] }
   0x4   :  { %154 = vmatpush.bf16.msra.mxu1 %v330_v5  ;;  %v329_v7 = vld [vmem:[%s478_s2 + $0x10] sm:$0xff]  ;;  %v328_v10 = vld [vmem:[%s478_s2 + $0x8] sm:$0xff]  ;;  %v327_v12 = vld [vmem:[%s478_s2] sm:$0xff]  ;;  %vm146_vm9 = vcmask 523264   ;;  %s383_s25 = smov [#allocation2]   ;;  %s266_s29 = sshll.u32 %s483_s7, 4  ;;  %s267_s29 = int_to_ptr.hbm [resolvable:$true] %s266_s29 }
   0x5   :  { %v334_v43 = vld [vmem:[%s479_s3 + $0x18] sm:$0xff]  ;;  %v339_v44 = vld [vmem:[%s481_s5] ss:$0 sm:$0xff]  ;;  %v333_v45 = vld [vmem:[%s479_s3 + $0x10] sm:$0xff]  ;;  %s264_s26 = sshll.u32 %s383_s25, 4  ;;  %s384_s30 = smov 128   ;;  %s265_s26 = int_to_ptr.vmem [resolvable:$true] %s264_s26 }
   0x6   :  { %62 = vmatpush.bf16.msra.mxu0 %v325_v1  ;;  %248 = vmatpush.bf16.msra.mxu2 %v334_v43  ;;  %v332_v48 = vld [vmem:[%s479_s3 + $0x8] sm:$0xff]  ;;  %v331_v50 = vld [vmem:[%s479_s3] sm:$0xff]  ;;  %s385_s8 = smov 8  }
   0x8   :  { %155 = vmatpush.bf16.msra.mxu1 %v329_v7 }
   0x9   :  { %286 = vmatmul.msk.bf16.vlgmr.msra.gmra.mxu0 %vm51_vm0, %v30_v4 }
   0xa   :  { %249 = vmatpush.bf16.msra.mxu2 %v333_v45 }
   0xc   :  { %156 = vmatpush.bf16.msra.mxu1 %v328_v10 }
   0xe   :  { %250 = vmatpush.bf16.msra.mxu2 %v332_v48 }
  0x10   :  { %157 = vmatpush.bf16.msra.mxu1 %v327_v12 }
  0x12   :  { %251 = vmatpush.bf16.msra.mxu2 %v331_v50 }
  0x86   :  { %v64_v8 = vpop.f32.mrf.mxu0 }
  0x87   :  { %v65_v9 = vadd.f32 %v338_v6, %v64_v8 }
  0x89   :  { %v287_v11 = vmul.f32 -1.442695, %v65_v9 }
  0x8b   :  { %341 = vpow2.f32 %v287_v11 }
  0x8e   :  { %v66_v13 = vpop.f32.mrf.mxu0 }
  0x8f   :  { %v67_v14 = vadd.f32 %v338_v6, %v66_v13 }
  0x91   :  { %v342_v15 = vpop.eup %341  ;;  %v288_v16 = vmul.f32 -1.442695, %v67_v14 }
  0x92   :  { %v75_v17 = vadd.f32 1.0, %v342_v15 }
  0x93   :  { %343 = vpow2.f32 %v288_v16 }
  0x94   :  { %345 = vrcp.f32 %v75_v17  ;;  %v88_v27 = vand.u32 2147483648, %v75_v17  ;;  %vm82_vm2 = vweird.f32 %v75_v17  ;;  %v86_v28 = vand.u32 2147483647, %v75_v17 }
  0x96   :  { %v89_v34 = vor.u32 1.1754944e-38, %v88_v27  ;;  %vm87_vm5 = vcmp.eq.f32.partialorder %v86_v28, 8.507059e+37 }
  0x99   :  { %v344_v18 = vpop.eup %343 }
  0x9a   :  { %v346_v19 = vpop.eup %345  ;;  %v76_v20 = vadd.f32 1.0, %v344_v18 }
  0x9b   :  { %v78_v21 = vmul.f32 %v346_v19, %v75_v17  ;;  %vm83_vm1 = vweird.f32 %v346_v19  ;;  %v340_v17 = vld [vmem:[%s482_s6] ss:$0 sm:$0xff] }
  0x9c   :  { %347 = vrcp.f32 %v76_v20  ;;  %vm84_vm3 = vmor %vm82_vm2, %vm83_vm1  ;;  %v103_v30 = vand.u32 2147483648, %v76_v20  ;;  %v101_v33 = vand.u32 2147483647, %v76_v20  ;;  %vm97_vm6 = vweird.f32 %v76_v20 }
  0x9d   :  { %v79_v22 = vsub.f32 1.0, %v78_v21 }
  0x9e   :  { %v104_v37 = vor.u32 1.1754944e-38, %v103_v30  ;;  %vm102_vm8 = vcmp.eq.f32.partialorder %v101_v33, 8.507059e+37 }
  0x9f   :  { %v80_v23 = vmul.f32 %v346_v19, %v79_v22 }
  0xa1   :  { %v81_v25 = vadd.f32 %v346_v19, %v80_v23 }
  0xa2   :  { %v348_v24 = vpop.eup %347 }
  0xa3   :  { %v93_v26 = vmul.f32 %v348_v24, %v76_v20  ;;  %v85_v31 = vsel %vm84_vm3, %v346_v19, %v81_v25  ;;  %vm98_vm4 = vweird.f32 %v348_v24 }
  0xa4   :  { %v90_v36 = vsel %vm87_vm5, %v89_v34, %v85_v31  ;;  %vm99_vm7 = vmor %vm97_vm6, %vm98_vm4 }
  0xa5   :  { %v94_v29 = vsub.f32 1.0, %v93_v26  ;;  %v107_v40 = vmul.f32 %v90_v36, %v65_v9 }
  0xa7   :  { %v95_v32 = vmul.f32 %v348_v24, %v94_v29 }
  0xa9   :  { %v96_v35 = vadd.f32 %v348_v24, %v95_v32 }
  0xab   :  { %v100_v38 = vsel %vm99_vm7, %v348_v24, %v96_v35 }
  0xac   :  { %v105_v39 = vsel %vm102_vm8, %v104_v37, %v100_v38 }
  0xad   :  { %v108_v41 = vmul.f32 %v105_v39, %v67_v14 }
  0xaf   :  { %v109_v42 = vpack.c.bf16 %v108_v41, %v107_v40 }
  0xb1   :  { %305 = vmatmul.msk.bf16.vlgmr.msra.gmra.mxu1 %vm146_vm9, %v109_v42 }
 0x12e   :  { %v159_v46 = vpop.f32.mrf.mxu1 }
 0x12f   :  { %v160_v47 = vadd.f32 %v339_v44, %v159_v46 }
 0x131   :  { %v306_v49 = vmul.f32 -1.442695, %v160_v47 }
 0x133   :  { %349 = vpow2.f32 %v306_v49 }
 0x136   :  { %v161_v51 = vpop.f32.mrf.mxu1 }
 0x137   :  { %v162_v52 = vadd.f32 %v339_v44, %v161_v51 }
 0x139   :  { %v350_v53 = vpop.eup %349  ;;  %v307_v54 = vmul.f32 -1.442695, %v162_v52 }
 0x13a   :  { %v170_v55 = vadd.f32 1.0, %v350_v53 }
 0x13b   :  { %351 = vpow2.f32 %v307_v54 }
 0x13c   :  { %353 = vrcp.f32 %v170_v55  ;;  %v183_v1 = vand.u32 2147483648, %v170_v55  ;;  %vm177_vm11 = vweird.f32 %v170_v55  ;;  %v181_v2 = vand.u32 2147483647, %v170_v55 }
 0x13e   :  { %v184_v8 = vor.u32 1.1754944e-38, %v183_v1  ;;  %vm182_vm14 = vcmp.eq.f32.partialorder %v181_v2, 8.507059e+37 }
 0x141   :  { %v352_v56 = vpop.eup %351 }
 0x142   :  { %v354_v57 = vpop.eup %353  ;;  %v171_v58 = vadd.f32 1.0, %v352_v56 }
 0x143   :  { %v173_v59 = vmul.f32 %v354_v57, %v170_v55  ;;  %vm178_vm10 = vweird.f32 %v354_v57 }
 0x144   :  { %355 = vrcp.f32 %v171_v58  ;;  %vm179_vm12 = vmor %vm177_vm11, %vm178_vm10  ;;  %v198_v4 = vand.u32 2147483648, %v171_v58  ;;  %v196_v7 = vand.u32 2147483647, %v171_v58  ;;  %vm192_vm15 = vweird.f32 %v171_v58 }
 0x145   :  { %v174_v60 = vsub.f32 1.0, %v173_v59 }
 0x146   :  { %v199_v11 = vor.u32 1.1754944e-38, %v198_v4  ;;  %vm197_vm1 = vcmp.eq.f32.partialorder %v196_v7, 8.507059e+37 }
 0x147   :  { %v175_v61 = vmul.f32 %v354_v57, %v174_v60 }
 0x149   :  { %v176_v63 = vadd.f32 %v354_v57, %v175_v61 }
 0x14a   :  { %v356_v62 = vpop.eup %355 }
 0x14b   :  { %v188_v0 = vmul.f32 %v356_v62, %v171_v58  ;;  %v180_v5 = vsel %vm179_vm12, %v354_v57, %v176_v63  ;;  %vm193_vm13 = vweird.f32 %v356_v62 }
 0x14c   :  { %v185_v10 = vsel %vm182_vm14, %v184_v8, %v180_v5  ;;  %vm194_vm0 = vmor %vm192_vm15, %vm193_vm13 }
 0x14d   :  { %v189_v3 = vsub.f32 1.0, %v188_v0  ;;  %v202_v14 = vmul.f32 %v185_v10, %v160_v47 }
 0x14f   :  { %v190_v6 = vmul.f32 %v356_v62, %v189_v3 }
 0x151   :  { %v191_v9 = vadd.f32 %v356_v62, %v190_v6 }
 0x153   :  { %v195_v12 = vsel %vm194_vm0, %v356_v62, %v191_v9 }
 0x154   :  { %v200_v13 = vsel %vm197_vm1, %v199_v11, %v195_v12 }
 0x155   :  { %v203_v15 = vmul.f32 %v200_v13, %v162_v52 }
 0x157   :  { %v204_v16 = vpack.c.bf16 %v203_v15, %v202_v14 }
 0x159   :  { %324 = vmatmul.msk.bf16.vlgmr.msra.gmra.mxu2 %vm146_vm9, %v204_v16 }
 0x1dc   :  { %v253_v18 = vpop.f32.mrf.mxu2 }
 0x1dd   :  { %v254_v19 = vadd.f32 %v340_v17, %v253_v18 }
 0x1df   :  { %258 = vst [vmem:[#allocation2] sm:$0xff] %v254_v19 }
 0x1e4   :  { %v255_v20 = vpop.f32.mrf.mxu2 }
 0x1e5   :  { %v256_v21 = vadd.f32 %v340_v17, %v255_v20 }
 0x1e7   :  { %259 = vst [vmem:[#allocation2 + $0x8] sm:$0xff] %v256_v21 }
 0x1e8   :  { %272 = dma.vmem_to_hbm [thread:$0]  %s265_s26, 256, %s267_s29, [#allocation3], %s384_s30, %s384_s30, %s385_s8  }
 0x1e9   :  { %381 = dma.done.wait [#allocation3], 256  }
 0x1ea   :  { %382 = vsyncadd [#allocation3], 4294967040 }
 0x1eb   :  { %277 = vsyncpa [#allocation3], 1 }

</bundles_post_ra>
